<compile_context>
chip_gen: v7x
topology: tpu7x:2x2x1
jax: 0.10.0
libtpu: 0.0.40
codegen_flags: <defaults>
</compile_context>

<pallas_src>
import jax
import jax.numpy as jnp
from jax.experimental import pallas as pl
from jax.experimental.pallas import tpu as pltpu

FEAT = 128
N_LAYERS = 5
_VMEM_LIMIT_BYTES = 48 << 20  # <= ~48 MiB keeps headroom on v7x's 64 MiB physical VMEM


def _mlp_kernel(x_ref, w_ref, b_ref, o_ref):
    # x_ref: (bm, 128) f32   w_ref: (5, 128, 128) bf16   b_ref: (4, 1, 128) f32
    # o_ref: (bm, 128) f32
    h = x_ref[...].astype(jnp.bfloat16)  # bf16 activations feed the MXU directly
    for i in range(N_LAYERS):  # short fixed trip-count -> fully unrolled MXU chain
        acc = jnp.dot(h, w_ref[i], preferred_element_type=jnp.float32)
        if i > 0:  # fc1 (i == 0) has no bias; fc2..fc5 use b_ref[i-1]
            acc = acc + b_ref[i - 1]
        if i < N_LAYERS - 1:
            h = acc.astype(jnp.bfloat16)  # keep inter-layer activation bf16
        else:
            o_ref[...] = acc.astype(o_ref.dtype)


def _is_v7x():
    """Only v7x has 2 TensorCores per chip; gate the tile-splitting heuristic on it."""
    try:
        kind = jax.devices()[0].device_kind.lower()
        return ("v7" in kind) or ("7x" in kind)
    except Exception:  # pragma: no cover - conservative fallback
        return False


def _choose_bm_and_padded(batch, requested, split_across_cores):
    """Pick a multiple-of-8 tile <= requested, then pad the batch UP to a multiple of
    it (never shrink the tile to find a divisor)."""
    b8 = ((batch + 7) // 8) * 8
    bm = max(8, (min(requested, b8) // 8) * 8)
    if split_across_cores and b8 >= 16 and b8 // bm < 2:
        # v7x only: make at least 2 grid steps so both TensorCores get work.
        bm = max(8, (((b8 + 1) // 2 + 7) // 8) * 8)
    b_padded = ((b8 + bm - 1) // bm) * bm
    return bm, b_padded


def test_module_forward(x, w_bf16, b_f32, *, bm=4096):
    """x: (B, 128) f32; w_bf16: (5, 128, 128) pre-transposed (in, out) bf16;
    b_f32: (4, 1, 128) f32 biases for fc2..fc5 (fc1 is bias-free)."""
    B, F = x.shape
    assert F == FEAT
    # Casts are expected to have been done once at init; only cast if caller didn't.
    if w_bf16.dtype != jnp.bfloat16:
        w_bf16 = w_bf16.astype(jnp.bfloat16)
    if b_f32.dtype != jnp.float32:
        b_f32 = b_f32.astype(jnp.float32)

    bm_eff, b_padded = _choose_bm_and_padded(B, bm, split_across_cores=_is_v7x())
    if b_padded != B:
        x = jnp.pad(x, ((0, b_padded - B), (0, 0)))
    grid = (b_padded // bm_eff,)

    out = pl.pallas_call(
        _mlp_kernel,
        out_shape=jax.ShapeDtypeStruct((b_padded, FEAT), x.dtype),
        grid_spec=pltpu.PrefetchScalarGridSpec(
            num_scalar_prefetch=0,
            grid=grid,
            in_specs=[
                pl.BlockSpec((bm_eff, FEAT), lambda i: (i, 0)),
                # Constant index_map -> weights/biases DMA'd once, resident in VMEM.
                pl.BlockSpec((N_LAYERS, FEAT, FEAT), lambda i: (0, 0, 0)),
                pl.BlockSpec((N_LAYERS - 1, 1, FEAT), lambda i: (0, 0, 0)),
            ],
            out_specs=pl.BlockSpec((bm_eff, FEAT), lambda i: (i, 0)),
        ),
        compiler_params=pltpu.CompilerParams(
            dimension_semantics=("parallel",),
            vmem_limit_bytes=_VMEM_LIMIT_BYTES,
        ),
    )(x, w_bf16, b_f32)

    return out[:B] if b_padded != B else out


def init_params(key):
    """Deterministic init. PyTorch Linear weight is (out, in); build that shape then
    transpose to (in, out) so the kernel computes x @ W directly. The bf16 weight
    copy is cached here so forward() never pays for per-call casts."""
    keys = jax.random.split(key, 2 * N_LAYERS + 1)
    bound = 1.0 / jnp.sqrt(FEAT)  # nn.Linear default uniform bound
    w_list, b_list = [], []
    for layer in range(N_LAYERS):
        w = jax.random.uniform(keys[2 * layer], (FEAT, FEAT), jnp.float32, -bound, bound)
        w_list.append(w.T)  # (in, out)
        if layer > 0:  # fc1 has bias=False -> no bias slot stored at all
            b = jax.random.uniform(keys[2 * layer + 1], (FEAT,), jnp.float32, -bound, bound)
            b_list.append(b.reshape(1, FEAT))
    w_stack_f32 = jnp.stack(w_list, axis=0)          # (5, 128, 128) f32 (reference)
    b_stack = jnp.stack(b_list, axis=0)              # (4, 1, 128) f32  fc2..fc5 biases
    w_stack_bf16 = w_stack_f32.astype(jnp.bfloat16)  # cached one-time cast for kernel
    # Unused-in-forward parameter, kept only for parity with the module.
    unused_param = jax.random.normal(keys[-1], (1237,), jnp.float32)
    return w_stack_bf16, b_stack, w_stack_f32, unused_param


def reference_forward(x, w_stack_f32, b_stack):
    """Pure-f32 JAX reference (matches the PyTorch module's math exactly)."""
    h = x
    for i in range(N_LAYERS):
        h = h @ w_stack_f32[i]
        if i > 0:
            h = h + b_stack[i - 1]
    return h


if __name__ == "__main__":
    key = jax.random.PRNGKey(0)
    k_x, k_p = jax.random.split(key)
    B = 8  # tiny test batch; wrapper clamps bm to B (grid=(1,)) as intended
    x = jax.random.normal(k_x, (B, FEAT), jnp.float32)
    w_bf16, b_f32, w_f32_ref, _unused = init_params(k_p)

    out = test_module_forward(x, w_bf16, b_f32)
    out = jax.block_until_ready(out)

    ref = reference_forward(x, w_f32_ref, b_f32)
    assert out.shape == (B, FEAT)
    # bf16 MXU operands / bf16 inter-layer activations (f32 accumulation) ->
    # loosened tolerance vs the pure-f32 reference.
    assert jnp.allclose(out, ref, atol=1e-2, rtol=1e-2), "mismatch vs JAX reference"

    print("KERNEL_OK")
</pallas_src>

<mosaic_0001>
module attributes {stable_mosaic.version = 11 : i64} {
  func.func @_mlp_kernel(%arg0: i32, %arg1: memref<8x128xf32, #tpu.memory_space<vmem>>, %arg2: memref<5x128x128xbf16, #tpu.memory_space<vmem>>, %arg3: memref<4x1x128xf32, #tpu.memory_space<vmem>>, %arg4: memref<8x128xf32, #tpu.memory_space<vmem>>) attributes {dimension_semantics = [#tpu.dimension_semantics<parallel>], iteration_bounds = array<i64: 1>, scalar_prefetch = 0 : i64, scratch_operands = 0 : i64, tpu.core_type = #tpu.core_type<tc>, window_params = [{transform_indices = @transform_0, window_bounds = array<i64: 8, 128>}, {pipeline_mode = #tpu.pipeline_mode<synchronous>, transform_indices = @transform_1, window_bounds = array<i64: 5, 128, 128>}, {pipeline_mode = #tpu.pipeline_mode<synchronous>, transform_indices = @transform_2, window_bounds = array<i64: 4, 1, 128>}, {transform_indices = @transform_3, window_bounds = array<i64: 8, 128>}]} {
    %c0 = arith.constant 0 : index
    %c0_0 = arith.constant 0 : index
    %0 = vector.load %arg1[%c0, %c0_0] : memref<8x128xf32, #tpu.memory_space<vmem>>, vector<8x128xf32>
    %1 = arith.truncf %0 : vector<8x128xf32> to vector<8x128xbf16>
    %c0_1 = arith.constant 0 : index
    %c0_2 = arith.constant 0 : index
    %c0_3 = arith.constant 0 : index
    %2 = vector.load %arg2[%c0_1, %c0_2, %c0_3] : memref<5x128x128xbf16, #tpu.memory_space<vmem>>, vector<1x128x128xbf16>
    %3 = vector.shape_cast %2 : vector<1x128x128xbf16> to vector<128x128xbf16>
    %cst = arith.constant dense<0.000000e+00> : vector<8x128xf32>
    %4 = tpu.matmul %1, %3, %cst {dimension_numbers = #tpu.dot_dimension_numbers<[1], [0], [0], [1], [0, 0, 1, 1], [], []>} : vector<8x128xbf16>, vector<128x128xbf16>, vector<8x128xf32> -> vector<8x128xf32>
    %5 = arith.truncf %4 : vector<8x128xf32> to vector<8x128xbf16>
    %c1 = arith.constant 1 : index
    %c0_4 = arith.constant 0 : index
    %c0_5 = arith.constant 0 : index
    %6 = vector.load %arg2[%c1, %c0_4, %c0_5] : memref<5x128x128xbf16, #tpu.memory_space<vmem>>, vector<1x128x128xbf16>
    %7 = vector.shape_cast %6 : vector<1x128x128xbf16> to vector<128x128xbf16>
    %cst_6 = arith.constant dense<0.000000e+00> : vector<8x128xf32>
    %8 = tpu.matmul %5, %7, %cst_6 {dimension_numbers = #tpu.dot_dimension_numbers<[1], [0], [0], [1], [0, 0, 1, 1], [], []>} : vector<8x128xbf16>, vector<128x128xbf16>, vector<8x128xf32> -> vector<8x128xf32>
    %c0_7 = arith.constant 0 : index
    %c0_8 = arith.constant 0 : index
    %c0_9 = arith.constant 0 : index
    %9 = vector.load %arg3[%c0_7, %c0_8, %c0_9] : memref<4x1x128xf32, #tpu.memory_space<vmem>>, vector<1x1x128xf32>
    %10 = vector.shape_cast %9 : vector<1x1x128xf32> to vector<1x128xf32>
    %11 = vector.broadcast %10 : vector<1x128xf32> to vector<8x128xf32>
    %12 = arith.addf %8, %11 : vector<8x128xf32>
    %13 = arith.truncf %12 : vector<8x128xf32> to vector<8x128xbf16>
    %c2 = arith.constant 2 : index
    %c0_10 = arith.constant 0 : index
    %c0_11 = arith.constant 0 : index
    %14 = vector.load %arg2[%c2, %c0_10, %c0_11] : memref<5x128x128xbf16, #tpu.memory_space<vmem>>, vector<1x128x128xbf16>
    %15 = vector.shape_cast %14 : vector<1x128x128xbf16> to vector<128x128xbf16>
    %cst_12 = arith.constant dense<0.000000e+00> : vector<8x128xf32>
    %16 = tpu.matmul %13, %15, %cst_12 {dimension_numbers = #tpu.dot_dimension_numbers<[1], [0], [0], [1], [0, 0, 1, 1], [], []>} : vector<8x128xbf16>, vector<128x128xbf16>, vector<8x128xf32> -> vector<8x128xf32>
    %c1_13 = arith.constant 1 : index
    %c0_14 = arith.constant 0 : index
    %c0_15 = arith.constant 0 : index
    %17 = vector.load %arg3[%c1_13, %c0_14, %c0_15] : memref<4x1x128xf32, #tpu.memory_space<vmem>>, vector<1x1x128xf32>
    %18 = vector.shape_cast %17 : vector<1x1x128xf32> to vector<1x128xf32>
    %19 = vector.broadcast %18 : vector<1x128xf32> to vector<8x128xf32>
    %20 = arith.addf %16, %19 : vector<8x128xf32>
    %21 = arith.truncf %20 : vector<8x128xf32> to vector<8x128xbf16>
    %c3 = arith.constant 3 : index
    %c0_16 = arith.constant 0 : index
    %c0_17 = arith.constant 0 : index
    %22 = vector.load %arg2[%c3, %c0_16, %c0_17] : memref<5x128x128xbf16, #tpu.memory_space<vmem>>, vector<1x128x128xbf16>
    %23 = vector.shape_cast %22 : vector<1x128x128xbf16> to vector<128x128xbf16>
    %cst_18 = arith.constant dense<0.000000e+00> : vector<8x128xf32>
    %24 = tpu.matmul %21, %23, %cst_18 {dimension_numbers = #tpu.dot_dimension_numbers<[1], [0], [0], [1], [0, 0, 1, 1], [], []>} : vector<8x128xbf16>, vector<128x128xbf16>, vector<8x128xf32> -> vector<8x128xf32>
    %c2_19 = arith.constant 2 : index
    %c0_20 = arith.constant 0 : index
    %c0_21 = arith.constant 0 : index
    %25 = vector.load %arg3[%c2_19, %c0_20, %c0_21] : memref<4x1x128xf32, #tpu.memory_space<vmem>>, vector<1x1x128xf32>
    %26 = vector.shape_cast %25 : vector<1x1x128xf32> to vector<1x128xf32>
    %27 = vector.broadcast %26 : vector<1x128xf32> to vector<8x128xf32>
    %28 = arith.addf %24, %27 : vector<8x128xf32>
    %29 = arith.truncf %28 : vector<8x128xf32> to vector<8x128xbf16>
    %c4 = arith.constant 4 : index
    %c0_22 = arith.constant 0 : index
    %c0_23 = arith.constant 0 : index
    %30 = vector.load %arg2[%c4, %c0_22, %c0_23] : memref<5x128x128xbf16, #tpu.memory_space<vmem>>, vector<1x128x128xbf16>
    %31 = vector.shape_cast %30 : vector<1x128x128xbf16> to vector<128x128xbf16>
    %cst_24 = arith.constant dense<0.000000e+00> : vector<8x128xf32>
    %32 = tpu.matmul %29, %31, %cst_24 {dimension_numbers = #tpu.dot_dimension_numbers<[1], [0], [0], [1], [0, 0, 1, 1], [], []>} : vector<8x128xbf16>, vector<128x128xbf16>, vector<8x128xf32> -> vector<8x128xf32>
    %c3_25 = arith.constant 3 : index
    %c0_26 = arith.constant 0 : index
    %c0_27 = arith.constant 0 : index
    %33 = vector.load %arg3[%c3_25, %c0_26, %c0_27] : memref<4x1x128xf32, #tpu.memory_space<vmem>>, vector<1x1x128xf32>
    %34 = vector.shape_cast %33 : vector<1x1x128xf32> to vector<1x128xf32>
    %35 = vector.broadcast %34 : vector<1x128xf32> to vector<8x128xf32>
    %36 = arith.addf %32, %35 : vector<8x128xf32>
    %c0_28 = arith.constant 0 : index
    %c0_29 = arith.constant 0 : index
    %37 = vector.load %arg4[%c0_28, %c0_29] : memref<8x128xf32, #tpu.memory_space<vmem>>, vector<8x128xf32>
    tpu.vector_store %arg4[%c0_28, %c0_29], %36 {strides = array<i32>} : memref<8x128xf32, #tpu.memory_space<vmem>>, vector<8x128xf32>,
    return
  }
  func.func @transform_0(%arg0: i32) -> (i32, i32) {
    %c0_i32 = arith.constant 0 : i32
    %c0_i32_0 = arith.constant 0 : i32
    return %arg0, %c0_i32 : i32, i32
  }
  func.func @transform_1(%arg0: i32) -> (i32, i32, i32) {
    %c0_i32 = arith.constant 0 : i32
    %c0_i32_0 = arith.constant 0 : i32
    %c0_i32_1 = arith.constant 0 : i32
    %c0_i32_2 = arith.constant 0 : i32
    return %c0_i32, %c0_i32_0, %c0_i32_1 : i32, i32, i32
  }
  func.func @transform_2(%arg0: i32) -> (i32, i32, i32) {
    %c0_i32 = arith.constant 0 : i32
    %c0_i32_0 = arith.constant 0 : i32
    %c0_i32_1 = arith.constant 0 : i32
    %c0_i32_2 = arith.constant 0 : i32
    return %c0_i32, %c0_i32_0, %c0_i32_1 : i32, i32, i32
  }
  func.func @transform_3(%arg0: i32) -> (i32, i32) {
    %c0_i32 = arith.constant 0 : i32
    %c0_i32_0 = arith.constant 0 : i32
    return %arg0, %c0_i32 : i32, i32
  }
}

</mosaic_0001>

<bundles_post_ra>
// kernel: tpu_custom_call.1
= control target key start
LH: loop header
LB: loop body
LE: loop exit
PB: predicated region body
PF: predicated region fallthrough
CT: control target
= control target key end

     0   :  { %8 = vsyncpa [#allocation3], 0  ;;  %s1063_s0 = inlined_call_operand.hbm [shape: f32[8,128], index: 0, kind: input, shape index: {}]   ;;  %s1064_s1 = inlined_call_operand.hbm [shape: bf16[5,128,128], index: 1, kind: input, shape index: {}]   ;;  %s1065_s2 = inlined_call_operand.vmem [shape: f32[4,1,128], index: 2, kind: input, shape index: {}]   ;;  %s1066_s3 = inlined_call_operand.hbm [shape: f32[8,128], index: 3, kind: output, shape index: {}]  }
   0x1   :  { %9 = vsyncpa [#allocation6], 0 }
   0x2   :  { %10 = vsyncpa [#allocation4], 0  ;;  %s931_s12 = smov [#allocation2]   ;;  %s932_s14 = smov [#allocation5]  }
   0x3   :  { %s17_s13 = sshll.u32 %s931_s12, 4  ;;  %s26_s15 = sshll.u32 %s932_s14, 4  ;;  %s18_s13 = int_to_ptr.vmem [resolvable:$true] %s17_s13  ;;  %s958_s15 = int_to_ptr.vmem [resolvable:$true] %s26_s15 }
   0x4   :  { %s859_s18 = scalar_lea.hbm %s1063_s0, 128 }
   0x5   :  { %p860_p0 = scmp.ne.s32.totalorder %s1063_s0, %s859_s18  ;;  %p863_p1 = scmp.lt.u32.totalorder %s859_s18, %s1063_s0 }
   0x7   :  { %p865_p2 = pnand %p863_p1, %p860_p0 }
   0x9   :  { %868 = shalt.err (!%p865_p2)
}
   0xa   :  { %s869_s23 = scalar_lea.vmem %s18_s13, 128  ;;  %p874_p4 = scmp.lt.s32.totalorder %s18_s13, %s18_s13 }
   0xb   :  { %p870_p3 = scmp.ne.s32.totalorder %s18_s13, %s869_s23  ;;  %p875_p5 = scmp.lt.s32.totalorder %s869_s23, %s869_s23 }
   0xd   :  { %p876_p6 = por %p875_p5, %p874_p4 }
   0xf   :  { %p877_p7 = pnand %p876_p6, %p870_p3 }
  0x11   :  { %880 = shalt.err (!%p877_p7)
}
  0x12   :  { %20 = dma.hbm_to_vmem [thread:$0]  %s1063_s0, 128, %s18_s13, [#allocation3]  }
  0x13   :  { %s881_s28 = scalar_lea.hbm %s1064_s1, 5120 }
  0x14   :  { %p882_p8 = scmp.ne.s32.totalorder %s1064_s1, %s881_s28  ;;  %p885_p9 = scmp.lt.u32.totalorder %s881_s28, %s1064_s1 }
  0x16   :  { %p887_p10 = pnand %p885_p9, %p882_p8 }
  0x18   :  { %890 = shalt.err (!%p887_p10)
}
  0x19   :  { %s891_s6 = scalar_lea.vmem %s958_s15, 5120  ;;  %p896_p12 = scmp.lt.s32.totalorder %s958_s15, %s958_s15 }
  0x1a   :  { %p892_p11 = scmp.ne.s32.totalorder %s958_s15, %s891_s6  ;;  %p897_p13 = scmp.lt.s32.totalorder %s891_s6, %s891_s6 }
  0x1c   :  { %p898_p0 = por %p897_p13, %p896_p12 }
  0x1e   :  { %p899_p1 = pnand %p898_p0, %p892_p11 }
  0x20   :  { %902 = shalt.err (!%p899_p1)
}
  0x21   :  { %s933_s0 = smov 64   ;;  %s934_s7 = smov 4  }
  0x22   :  { %32 = dma.hbm_to_vmem [thread:$0]  %s1064_s1, 5120, %s958_s15, [#allocation6], %s933_s0, %s933_s0, %s934_s7  }
  0x23   :  { %925 = dma.done.wait [#allocation3], 128  }
  0x24   :  { %926 = vsyncadd [#allocation3], 4294967168 }
  0x25   :  { %927 = dma.done.wait [#allocation6], 5120  }
  0x26   :  { %928 = vsyncadd [#allocation6], 4294962176  ;;  %v935_v0 = vmov 0.0   ;;  %vm936_vm0 = vmmov 0   ;;  %v819_v1 = vld [vmem:[#allocation5] sm:$0xff]   ;;  %v820_v2 = vld [vmem:[#allocation5 + $0x8] sm:$0xff]  }
  0x27   :  { %712 = vmatprep.subr.bf16.mxu0 %v935_v0  ;;  %728 = vmatprep.mubr.msk.bf16.mxu0 %vm936_vm0, %v935_v0  ;;  %v821_v3 = vld [vmem:[#allocation5 + $0x10] sm:$0xff]   ;;  %v827_v4 = vld [vmem:[#allocation5 + $0x40] sm:$0xff]   ;;  %v822_v5 = vld [vmem:[#allocation5 + $0x18] sm:$0xff]   ;;  %s937_s17 = smov [#allocation7]  }
  0x28   :  { %732 = vmatprep.subr.bf16.mxu1 %v935_v0  ;;  %748 = vmatprep.mubr.msk.bf16.mxu1 %vm936_vm0, %v935_v0  ;;  %v828_v6 = vld [vmem:[#allocation5 + $0x48] sm:$0xff]   ;;  %v823_v7 = vld [vmem:[#allocation5 + $0x20] sm:$0xff]   ;;  %v829_v8 = vld [vmem:[#allocation5 + $0x50] sm:$0xff]   ;;  %s610_s18 = sshll.u32 %s937_s17, 4  ;;  %s611_s18 = int_to_ptr.vmem [resolvable:$true] %s610_s18 }
  0x29   :  { %713 = vmatpush3.bf16.msra.mxu0 %v819_v1  ;;  %733 = vmatpush3.bf16.msra.mxu1 %v827_v4  ;;  %v824_v9 = vld [vmem:[#allocation5 + $0x28] sm:$0xff]   ;;  %v830_v10 = vld [vmem:[#allocation5 + $0x58] sm:$0xff]   ;;  %v825_v11 = vld [vmem:[#allocation5 + $0x30] sm:$0xff]   ;;  %s903_s19 = scalar_lea.vmem %s611_s18, 128  ;;  %p908_p3 = scmp.lt.s32.totalorder %s611_s18, %s611_s18 }
  0x2a   :  { %714 = vmatprep.subr.bf16.mxu0 %v935_v0  ;;  %734 = vmatprep.subr.bf16.mxu1 %v935_v0  ;;  %v831_v12 = vld [vmem:[#allocation5 + $0x60] sm:$0xff]   ;;  %v826_v13 = vld [vmem:[#allocation5 + $0x38] sm:$0xff]   ;;  %v832_v15 = vld [vmem:[#allocation5 + $0x68] sm:$0xff]   ;;  %p904_p2 = scmp.ne.s32.totalorder %s611_s18, %s903_s19  ;;  %p909_p4 = scmp.lt.s32.totalorder %s903_s19, %s903_s19 }
  0x2b   :  { %v42_v14 = vld [vmem:[#allocation2] sm:$0xff]  ;;  %v833_v17 = vld [vmem:[#allocation5 + $0x70] sm:$0xff]   ;;  %v835_v19 = vld [vmem:[#allocation5 + $0x80] sm:$0xff]  }
  0x2c   :  { %v43_v16 = vpack.c.bf16 %v42_v14, %v42_v14  ;;  %v834_v18 = vld [vmem:[#allocation5 + $0x78] sm:$0xff]   ;;  %v836_v20 = vld [vmem:[#allocation5 + $0x88] sm:$0xff]   ;;  %v837_v21 = vld [vmem:[#allocation5 + $0x90] sm:$0xff]   ;;  %p910_p5 = por %p909_p4, %p908_p3 }
  0x2d   :  { %715 = vmatpush3.bf16.msra.mxu0 %v820_v2  ;;  %735 = vmatpush3.bf16.msra.mxu1 %v828_v6  ;;  %v838_v22 = vld [vmem:[#allocation5 + $0x98] sm:$0xff]   ;;  %v839_v23 = vld [vmem:[#allocation5 + $0xa0] sm:$0xff]   ;;  %v840_v24 = vld [vmem:[#allocation5 + $0xa8] sm:$0xff]  }
  0x2e   :  { %716 = vmatprep.subr.bf16.mxu0 %v935_v0  ;;  %736 = vmatprep.subr.bf16.mxu1 %v935_v0  ;;  %v841_v25 = vld [vmem:[#allocation5 + $0xb0] sm:$0xff]   ;;  %v842_v31 = vld [vmem:[#allocation5 + $0xb8] sm:$0xff]   ;;  %v843_v32 = vld [vmem:[#allocation5 + $0xc0] sm:$0xff]   ;;  %p911_p6 = pnand %p910_p5, %p904_p2 }
  0x2f   :  { %v844_v33 = vld [vmem:[#allocation5 + $0xc8] sm:$0xff]   ;;  %v845_v34 = vld [vmem:[#allocation5 + $0xd0] sm:$0xff]   ;;  %v846_v35 = vld [vmem:[#allocation5 + $0xd8] sm:$0xff]  }
  0x30   :  { %v847_v36 = vld [vmem:[#allocation5 + $0xe0] sm:$0xff]   ;;  %v848_v37 = vld [vmem:[#allocation5 + $0xe8] sm:$0xff]   ;;  %v849_v38 = vld [vmem:[#allocation5 + $0xf0] sm:$0xff]  }
  0x31   :  { %717 = vmatpush3.bf16.msra.mxu0 %v821_v3  ;;  %737 = vmatpush3.bf16.msra.mxu1 %v829_v8  ;;  %v628_v39 = vld [vmem:[%s1065_s2] ss:$0 sm:$0xff]  ;;  %v851_v47 = vld [vmem:[#allocation5 + $0x100] sm:$0xff]   ;;  %v852_v48 = vld [vmem:[#allocation5 + $0x108] sm:$0xff]  }
  0x32   :  { %718 = vmatprep.subr.bf16.mxu0 %v935_v0  ;;  %738 = vmatprep.subr.bf16.mxu1 %v935_v0  ;;  %v850_v46 = vld [vmem:[#allocation5 + $0xf8] sm:$0xff]   ;;  %v853_v49 = vld [vmem:[#allocation5 + $0x110] sm:$0xff]   ;;  %v855_v51 = vld [vmem:[#allocation5 + $0x120] sm:$0xff]  }
  0x33   :  { %v854_v50 = vld [vmem:[#allocation5 + $0x118] sm:$0xff]   ;;  %v856_v52 = vld [vmem:[#allocation5 + $0x128] sm:$0xff]   ;;  %v857_v53 = vld [vmem:[#allocation5 + $0x130] sm:$0xff]  }
  0x34   :  { %v638_v54 = vld [vmem:[%s1065_s2 + $0x1] ss:$0 sm:$0xff]  ;;  %v648_v62 = vld [vmem:[%s1065_s2 + $0x2] ss:$0 sm:$0xff] }
  0x35   :  { %719 = vmatpush3.bf16.msra.mxu0 %v822_v5  ;;  %739 = vmatpush3.bf16.msra.mxu1 %v830_v10  ;;  %v858_v61 = vld [vmem:[#allocation5 + $0x138] sm:$0xff]  }
  0x36   :  { %720 = vmatprep.subr.bf16.mxu0 %v935_v0  ;;  %740 = vmatprep.subr.bf16.mxu1 %v935_v0  ;;  %v658_v5 = vld [vmem:[%s1065_s2 + $0x3] ss:$0 sm:$0xff] }
  0x39   :  { %721 = vmatpush3.bf16.msra.mxu0 %v823_v7  ;;  %741 = vmatpush3.bf16.msra.mxu1 %v831_v12 }
  0x3a   :  { %722 = vmatprep.subr.bf16.mxu0 %v935_v0  ;;  %742 = vmatprep.subr.bf16.mxu1 %v935_v0 }
  0x3d   :  { %723 = vmatpush3.bf16.msra.mxu0 %v824_v9  ;;  %743 = vmatpush3.bf16.msra.mxu1 %v832_v15 }
  0x3e   :  { %724 = vmatprep.subr.bf16.mxu0 %v935_v0  ;;  %744 = vmatprep.subr.bf16.mxu1 %v935_v0 }
  0x41   :  { %725 = vmatpush3.bf16.msra.mxu0 %v825_v11  ;;  %745 = vmatpush3.bf16.msra.mxu1 %v833_v17 }
  0x42   :  { %726 = vmatprep.subr.bf16.mxu0 %v935_v0  ;;  %746 = vmatprep.subr.bf16.mxu1 %v935_v0 }
  0x45   :  { %727 = vmatpush3.bf16.msra.mxu0 %v826_v13  ;;  %747 = vmatpush3.bf16.msra.mxu1 %v834_v18 }
  0x46   :  { %752 = vmatprep.subr.bf16.mxu0 %v935_v0  ;;  %772 = vmatprep.subr.bf16.mxu1 %v935_v0 }
  0x48   :  { %729 = vmatmul.mubr.bf16.vlgmr.msra.gmra.mrb[0].mxu0 %v43_v16 }
  0x49   :  { %768 = vmatprep.mubr.msk.bf16.mxu0 %vm936_vm0, %v935_v0  ;;  %753 = vmatpush3.bf16.msra.mxu0 %v835_v19 }
  0x4a   :  { %754 = vmatprep.subr.bf16.mxu0 %v935_v0 }
  0x4d   :  { %755 = vmatpush3.bf16.msra.mxu0 %v836_v20 }
  0x4e   :  { %756 = vmatprep.subr.bf16.mxu0 %v935_v0 }
  0x51   :  { %757 = vmatpush3.bf16.msra.mxu0 %v837_v21 }
  0x52   :  { %758 = vmatprep.subr.bf16.mxu0 %v935_v0 }
  0x55   :  { %759 = vmatpush3.bf16.msra.mxu0 %v838_v22 }
  0x56   :  { %760 = vmatprep.subr.bf16.mxu0 %v935_v0 }
  0x59   :  { %761 = vmatpush3.bf16.msra.mxu0 %v839_v23 }
  0x5a   :  { %762 = vmatprep.subr.bf16.mxu0 %v935_v0 }
  0x5d   :  { %763 = vmatpush3.bf16.msra.mxu0 %v840_v24 }
  0x5e   :  { %764 = vmatprep.subr.bf16.mxu0 %v935_v0 }
  0x61   :  { %765 = vmatpush3.bf16.msra.mxu0 %v841_v25 }
  0x62   :  { %766 = vmatprep.subr.bf16.mxu0 %v935_v0 }
  0x65   :  { %767 = vmatpush3.bf16.msra.mxu0 %v842_v31 }
  0x66   :  { %792 = vmatprep.subr.bf16.mxu0 %v935_v0 }
 0x11b   :  { %v142_v26 = vpop.f32.mrb[0].mxu0 }
 0x11c   :  { %v148_v27 = vpack.c.bf16 %v142_v26, %v142_v26  ;;  %v730_v28 = vpop.f32.mrb[1].mxu0 }
 0x11d   :  { %v145_v29 = vpop.f32.mrb[2].mxu0 }
 0x11e   :  { %v731_v30 = vpop.f32.mrb[3].mxu0  ;;  %749 = vmatmul.mubr.bf16.vlgmr.msra.gmra.mrb[0].mxu1 %v148_v27 }
 0x11f   :  { %788 = vmatprep.mubr.msk.bf16.mxu1 %vm936_vm0, %v935_v0  ;;  %773 = vmatpush3.bf16.msra.mxu1 %v843_v32 }
 0x120   :  { %774 = vmatprep.subr.bf16.mxu1 %v935_v0 }
 0x123   :  { %775 = vmatpush3.bf16.msra.mxu1 %v844_v33 }
 0x124   :  { %776 = vmatprep.subr.bf16.mxu1 %v935_v0 }
 0x127   :  { %777 = vmatpush3.bf16.msra.mxu1 %v845_v34 }
 0x128   :  { %778 = vmatprep.subr.bf16.mxu1 %v935_v0 }
 0x12b   :  { %779 = vmatpush3.bf16.msra.mxu1 %v846_v35 }
 0x12c   :  { %780 = vmatprep.subr.bf16.mxu1 %v935_v0 }
 0x12f   :  { %781 = vmatpush3.bf16.msra.mxu1 %v847_v36 }
 0x130   :  { %782 = vmatprep.subr.bf16.mxu1 %v935_v0 }
 0x133   :  { %783 = vmatpush3.bf16.msra.mxu1 %v848_v37 }
 0x134   :  { %784 = vmatprep.subr.bf16.mxu1 %v935_v0 }
 0x137   :  { %785 = vmatpush3.bf16.msra.mxu1 %v849_v38 }
 0x138   :  { %786 = vmatprep.subr.bf16.mxu1 %v935_v0 }
 0x13b   :  { %787 = vmatpush3.bf16.msra.mxu1 %v850_v46 }
 0x1f1   :  { %v255_v40 = vpop.f32.mrb[0].mxu1 }
 0x1f2   :  { %v256_v41 = vadd.f32 %v628_v39, %v255_v40  ;;  %v750_v42 = vpop.f32.mrb[1].mxu1 }
 0x1f3   :  { %v258_v43 = vpop.f32.mrb[2].mxu1 }
 0x1f4   :  { %v261_v44 = vpack.c.bf16 %v256_v41, %v256_v41  ;;  %v751_v45 = vpop.f32.mrb[3].mxu1 }
 0x1f6   :  { %769 = vmatmul.mubr.bf16.vlgmr.msra.gmra.mrb[4].mxu0 %v261_v44 }
 0x1f7   :  { %808 = vmatprep.mubr.msk.bf16.mxu0 %vm936_vm0, %v935_v0  ;;  %793 = vmatpush3.bf16.msra.mxu0 %v851_v47 }
 0x1f8   :  { %794 = vmatprep.subr.bf16.mxu0 %v935_v0 }
 0x1fb   :  { %795 = vmatpush3.bf16.msra.mxu0 %v852_v48 }
 0x1fc   :  { %796 = vmatprep.subr.bf16.mxu0 %v935_v0 }
 0x1ff   :  { %797 = vmatpush3.bf16.msra.mxu0 %v853_v49 }
 0x200   :  { %798 = vmatprep.subr.bf16.mxu0 %v935_v0 }
 0x203   :  { %799 = vmatpush3.bf16.msra.mxu0 %v854_v50 }
 0x204   :  { %800 = vmatprep.subr.bf16.mxu0 %v935_v0 }
 0x207   :  { %801 = vmatpush3.bf16.msra.mxu0 %v855_v51 }
 0x208   :  { %802 = vmatprep.subr.bf16.mxu0 %v935_v0 }
 0x20b   :  { %803 = vmatpush3.bf16.msra.mxu0 %v856_v52 }
 0x20c   :  { %804 = vmatprep.subr.bf16.mxu0 %v935_v0 }
 0x20f   :  { %805 = vmatpush3.bf16.msra.mxu0 %v857_v53 }
 0x210   :  { %806 = vmatprep.subr.bf16.mxu0 %v935_v0 }
 0x213   :  { %807 = vmatpush3.bf16.msra.mxu0 %v858_v61 }
 0x2c9   :  { %v369_v55 = vpop.f32.mrb[4].mxu0 }
 0x2ca   :  { %v370_v56 = vadd.f32 %v638_v54, %v369_v55  ;;  %v770_v57 = vpop.f32.mrb[5].mxu0 }
 0x2cb   :  { %v372_v58 = vpop.f32.mrb[6].mxu0 }
 0x2cc   :  { %v375_v59 = vpack.c.bf16 %v370_v56, %v370_v56  ;;  %v771_v60 = vpop.f32.mrb[7].mxu0 }
 0x2ce   :  { %789 = vmatmul.mubr.bf16.vlgmr.msra.gmra.mrb[4].mxu1 %v375_v59 }
 0x3a1   :  { %v483_v63 = vpop.f32.mrb[4].mxu1 }
 0x3a2   :  { %v484_v1 = vadd.f32 %v648_v62, %v483_v63  ;;  %v790_v0 = vpop.f32.mrb[5].mxu1 }
 0x3a3   :  { %v486_v2 = vpop.f32.mrb[6].mxu1 }
 0x3a4   :  { %v489_v3 = vpack.c.bf16 %v484_v1, %v484_v1  ;;  %v791_v4 = vpop.f32.mrb[7].mxu1 }
 0x3a6   :  { %809 = vmatmul.mubr.bf16.vlgmr.msra.gmra.mrb[8].mxu0 %v489_v3 }
 0x479   :  { %v597_v6 = vpop.f32.mrb[8].mxu0 }
 0x47a   :  { %v598_v7 = vadd.f32 %v658_v5, %v597_v6  ;;  %v810_v8 = vpop.f32.mrb[9].mxu0 }
 0x47b   :  { %v600_v9 = vpop.f32.mrb[10].mxu0 }
 0x47c   :  { %603 = vst [vmem:[#allocation7] sm:$0xff] %v598_v7  ;;  %v811_v10 = vpop.f32.mrb[11].mxu0 }
 0x47d   :  { %914 = shalt.err (!%p911_p6)
}
 0x47e   :  { %s915_s2 = scalar_lea.hbm %s1066_s3, 128 }
 0x47f   :  { %p916_p7 = scmp.ne.s32.totalorder %s1066_s3, %s915_s2  ;;  %p919_p8 = scmp.lt.u32.totalorder %s915_s2, %s1066_s3 }
 0x481   :  { %p921_p9 = pnand %p919_p8, %p916_p7 }
 0x483   :  { %924 = shalt.err (!%p921_p9)
}
 0x484   :  { %613 = dma.vmem_to_hbm [thread:$0]  %s611_s18, 128, %s1066_s3, [#allocation4]  }
 0x485   :  { %929 = dma.done.wait [#allocation4], 128  }
 0x486   :  { %930 = vsyncadd [#allocation4], 4294967168 }
 0x487   :  { %617 = vsyncpa [#allocation3], 1 }
 0x488   :  { %618 = vsyncpa [#allocation6], 1 }
 0x489   :  { %619 = vsyncpa [#allocation4], 1 }

</bundles_post_ra>
